<compile_context>
chip_gen: v5e
topology: v5e:2x2
jax: 0.10.0
libtpu: 0.0.40
codegen_flags: <defaults>
</compile_context>

<pallas_src>
import jax
import jax.numpy as jnp
from jax.experimental import pallas as pl
from jax.experimental.pallas import tpu as pltpu


def _round_up(x: int, m: int) -> int:
    return ((x + m - 1) // m) * m


def linear_kernel(x_ref, w_ref, b_ref, o_ref):
    # x_ref: (TM, F) VMEM tile, w_ref: (1, F) VMEM (resident), b_ref: (1,) SMEM,
    # o_ref: (TM, 1) VMEM tile.
    x = x_ref[...]
    w = w_ref[...]
    # y = sum_f x[:, f] * w[0, f] : VPU multiply + cross-lane reduce.
    # Avoids the (1, F) -> (F, 1) transpose relayout and an N=1 MXU matmul;
    # the kernel is HBM-bound so VPU/XLU have ample slack.
    y = jnp.sum(x * w, axis=-1, keepdims=True)
    o_ref[...] = (y + b_ref[0]).astype(o_ref.dtype)


def _pick_tile_m(B: int, F: int, itemsize: int = 4, vmem_budget: int = 16 << 20) -> int:
    # Keep (x tile bytes x 2 double-buffers) within a conservative budget that
    # fits v7x's 32 MiB default-scoped VMEM as well as v5e/v6e's 128 MiB.
    rows_fit = max(8, (vmem_budget // (2 * F * itemsize)) // 8 * 8)
    tm = min(1024, rows_fit, _round_up(B, 8))
    return max(8, (tm // 8) * 8)


def linear_net_forward(x, weight, bias):
    """Pallas forward pass of LinearNet: y = x @ weight.T + bias."""
    B, F = x.shape
    assert weight.shape == (1, F)
    assert bias.shape == (1,)

    tm = _pick_tile_m(B, F, x.dtype.itemsize)
    padded_b = _round_up(B, tm)
    x_p = x if padded_b == B else jnp.pad(x, ((0, padded_b - B), (0, 0)))

    # TODO(synk): if n_feature grows beyond a few thousand, add a second
    # "arbitrary" grid axis over F with an f32 VMEM accumulator
    # (pl.when(k==0) init, pl.when(k==last) bias-add + store). Not needed
    # for this module's n_feature=2.
    y_p = pl.pallas_call(
        linear_kernel,
        out_shape=jax.ShapeDtypeStruct((padded_b, 1), x.dtype),
        grid=(padded_b // tm,),
        in_specs=[
            # Batch-tiled x stream: enables BlockSpec double-buffering.
            pl.BlockSpec((tm, F), lambda i: (i, 0)),
            # Constant block index -> weight stays resident in VMEM.
            pl.BlockSpec((1, F), lambda i: (0, 0)),
            # Bias scalar in SMEM: no per-step VMEM DMA / broadcast.
            pl.BlockSpec(memory_space=pltpu.MemorySpace.SMEM),
        ],
        out_specs=pl.BlockSpec((tm, 1), lambda i: (i, 0)),
        compiler_params=pltpu.CompilerParams(
            # Independent batch tiles: shard across the two TensorCores on
            # v7x; harmless no-op on single-TC v5e/v6e.
            dimension_semantics=("parallel",),
        ),
    )(x_p, weight, bias)

    return y_p[:B]


if __name__ == "__main__":
    key = jax.random.PRNGKey(0)
    kx, kw, kb = jax.random.split(key, 3)

    batch, n_feature = 8, 2

    # Deterministic parameter init (matches nn.Linear default: U(-1/sqrt(F), 1/sqrt(F)))
    bound = 1.0 / jnp.sqrt(jnp.float32(n_feature))
    weight = jax.random.uniform(kw, (1, n_feature), jnp.float32, -bound, bound)
    bias = jax.random.uniform(kb, (1,), jnp.float32, -bound, bound)

    x = jax.random.normal(kx, (batch, n_feature), jnp.float32)

    y = linear_net_forward(x, weight, bias)
    jax.block_until_ready(y)

    # Reference check (plain JAX)
    y_ref = x @ weight.T + bias
    assert y.shape == (batch, 1)
    assert jnp.allclose(y, y_ref, atol=1e-5), "mismatch vs reference"

    print("KERNEL_OK")
</pallas_src>

<mosaic_0001>
module attributes {stable_mosaic.version = 11 : i64} {
  func.func @linear_kernel(%arg0: i32, %arg1: memref<8x2xf32, #tpu.memory_space<vmem>>, %arg2: memref<1x2xf32, #tpu.memory_space<vmem>>, %arg3: memref<1xf32, #tpu.memory_space<smem>>, %arg4: memref<8x1xf32, #tpu.memory_space<vmem>>) attributes {dimension_semantics = [#tpu.dimension_semantics<parallel>], iteration_bounds = array<i64: 1>, scalar_prefetch = 0 : i64, scratch_operands = 0 : i64, tpu.core_type = #tpu.core_type<tc>, window_params = [{transform_indices = @transform_0, window_bounds = array<i64: 8, 2>}, {pipeline_mode = #tpu.pipeline_mode<synchronous>, transform_indices = @transform_1, window_bounds = array<i64: 1, 2>}, {transform_indices = @transform_2, window_bounds = array<i64: 1>}, {transform_indices = @transform_3, window_bounds = array<i64: 8, 1>}]} {
    %c0 = arith.constant 0 : index
    %c0_0 = arith.constant 0 : index
    %0 = vector.load %arg1[%c0, %c0_0] : memref<8x2xf32, #tpu.memory_space<vmem>>, vector<8x2xf32>
    %c0_1 = arith.constant 0 : index
    %c0_2 = arith.constant 0 : index
    %1 = vector.load %arg2[%c0_1, %c0_2] : memref<1x2xf32, #tpu.memory_space<vmem>>, vector<1x2xf32>
    %2 = vector.broadcast %1 : vector<1x2xf32> to vector<8x2xf32>
    %3 = arith.mulf %0, %2 : vector<8x2xf32>
    %cst = arith.constant dense<0.000000e+00> : vector<8xf32>
    %4 = vector.multi_reduction <add>, %3, %cst [1] : vector<8x2xf32> to vector<8xf32>
    %5 = vector.shape_cast %4 : vector<8xf32> to vector<8x1xf32>
    %c0_3 = arith.constant 0 : index
    %6 = memref.load %arg3[%c0_3] : memref<1xf32, #tpu.memory_space<smem>>
    %7 = vector.broadcast %6 : f32 to vector<8x1xf32>
    %8 = arith.addf %5, %7 : vector<8x1xf32>
    %c0_4 = arith.constant 0 : index
    %c0_5 = arith.constant 0 : index
    %9 = vector.load %arg4[%c0_4, %c0_5] : memref<8x1xf32, #tpu.memory_space<vmem>>, vector<8x1xf32>
    tpu.vector_store %arg4[%c0_4, %c0_5], %8 {strides = array<i32>} : memref<8x1xf32, #tpu.memory_space<vmem>>, vector<8x1xf32>,
    return
  }
  func.func @transform_0(%arg0: i32) -> (i32, i32) {
    %c0_i32 = arith.constant 0 : i32
    %c0_i32_0 = arith.constant 0 : i32
    return %arg0, %c0_i32 : i32, i32
  }
  func.func @transform_1(%arg0: i32) -> (i32, i32) {
    %c0_i32 = arith.constant 0 : i32
    %c0_i32_0 = arith.constant 0 : i32
    %c0_i32_1 = arith.constant 0 : i32
    return %c0_i32, %c0_i32_0 : i32, i32
  }
  func.func @transform_2(%arg0: i32) -> i32 {
    %c0_i32 = arith.constant 0 : i32
    %c0_i32_0 = arith.constant 0 : i32
    return %c0_i32 : i32
  }
  func.func @transform_3(%arg0: i32) -> (i32, i32) {
    %c0_i32 = arith.constant 0 : i32
    %c0_i32_0 = arith.constant 0 : i32
    return %arg0, %c0_i32 : i32, i32
  }
}

</mosaic_0001>

<bundles_post_ra>
// kernel: tpu_custom_call.1
= control target key start
LH: loop header
LB: loop body
LE: loop exit
PB: predicated region body
PF: predicated region fallthrough
CT: control target
= control target key end

     0   :  { %vm21_vm0 = vcmask 15360   ;;  %vm28_vm1 = vcmask 7168   ;;  %s67_s0 = inlined_call_operand.vmem [shape: f32[8,2], index: 0, kind: input, shape index: {}]   ;;  %s68_s1 = inlined_call_operand.vmem [shape: f32[1,2], index: 1, kind: input, shape index: {}]   ;;  %s69_s2 = inlined_call_operand.<no memory space> [shape: f32[1], index: 2, kind: input, shape index: {}]   ;;  %s70_s3 = inlined_call_operand.vmem [shape: f32[8,1], index: 3, kind: output, shape index: {}]  }
   0x1   :  { %v15_v0 = vld [vmem:[%s67_s0] sm:$0xff]  ;;  %v26_v4 = vstv %s69_s2 }
   0x2   :  { %v34_v1 = vld [vmem:[%s68_s1] ss:$0 sm:$0xff] }
   0x3   :  { %v20_v2 = vmul.f32 %v34_v1, %v15_v0 }
   0x5   :  { %v22_v3 = vsel %vm21_vm0, %v20_v2, 0.0 }
   0x6   :  { %23 = vadd.xlane.f32.xlu0 %v22_v3 }
  0x79   :  { %v24_v5 = vpop.xlane.xlu0 %23 }
  0x7a   :  { %v27_v6 = vadd.f32 %v26_v4, %v24_v5 }
  0x7c   :  { %29 = vst.msk [vmem:[%s70_s3] sm:$0xff] %vm28_vm1, %v27_v6 }

</bundles_post_ra>
